<compile_context>
chip_gen: v6e
topology: v6e:2x2x1
jax: 0.10.0
libtpu: 0.0.40
codegen_flags: <defaults>
</compile_context>

<pallas_src>
import jax
import jax.numpy as jnp
from jax.experimental import pallas as pl
from jax.experimental.pallas import tpu as pltpu


def _round_up(x, m):
    return ((x + m - 1) // m) * m


def _cdiv(a, b):
    return (a + b - 1) // b


def value_net_kernel(xT_ref, w1_ref, b1_ref, w2_ref, b2_ref, o_ref):
    # xT_ref: (F, TB)   VMEM  batch tile, batch lane-dense
    # w1_ref: (Hp, F)   VMEM  resident across grid steps (PyTorch layout, H padded)
    # b1_ref: (Hp, 1)   VMEM  resident
    # w2_ref: (Hp, 1)   VMEM  resident (second-layer weights)
    # b2_ref: (1,)      SMEM  scalar bias
    # o_ref:  (1, TB)   VMEM  lane-dense output tile (batch on lanes)
    hT = jnp.dot(w1_ref[...], xT_ref[...],
                 preferred_element_type=jnp.float32)          # MXU: (Hp, TB)
    hT = hT + b1_ref[...]                                     # VPU lane-broadcast add
    # Sigmoid with a single EUP transcendental: sigmoid(h) = 0.5*(1 + tanh(h/2)).
    # Padded hidden rows give sigmoid(0)=0.5 but their w2 weight is 0.
    s = 0.5 * (1.0 + jnp.tanh(0.5 * hT))                       # EUP + VPU
    # Second Linear (out width 1): VPU multiply + sublane-axis reduction over Hp.
    v = jnp.sum(s * w2_ref[...], axis=0, keepdims=True) + b2_ref[0]   # (1, TB)
    o_ref[...] = v.astype(o_ref.dtype)                         # lane-dense store


def prepare_params(w1, b1, w2, b2):
    """One-time packing of PyTorch-layout params into the kernel layout.

    w1: (H, F)  -- nn.Linear(num_features, hidden).weight
    b1: (H,)
    w2: (1, H)  -- nn.Linear(hidden, 1).weight
    b2: (1,)
    Hidden dim is padded to a multiple of 8 (it lives on the sublane axis in the
    transposed formulation).  Hoisted out of the per-call forward path.
    """
    H, _ = w1.shape
    Hp = _round_up(H, 8)
    ph = Hp - H
    w1p = jnp.pad(w1.astype(jnp.float32), ((0, ph), (0, 0)))                    # (Hp, F)
    b1p = jnp.pad(b1.astype(jnp.float32).reshape(H, 1), ((0, ph), (0, 0)))      # (Hp, 1)
    w2p = jnp.pad(w2.astype(jnp.float32).reshape(H, 1), ((0, ph), (0, 0)))      # (Hp, 1)
    b2s = b2.reshape(1).astype(jnp.float32)                                     # (1,) SMEM
    return w1p, b1p, w2p, b2s


def _choose_tile_b(B, F, Hp, max_tile_b, vmem_budget_bytes):
    """Pick the batch tile: multiple of 128, sized from a VMEM budget, >=2 tiles."""
    itemsize = 4
    # Resident weights (assume worst case: pipeline double-buffers them).
    weight_bytes = 2 * (Hp * F + 2 * Hp) * itemsize
    avail = max(vmem_budget_bytes - weight_bytes, 1 << 20)
    # Per batch element: x^T double-buffered + ~3 (Hp,) f32 intermediates
    # (h, sigmoid, product) + double-buffered output row (8-sublane padded).
    per_elem = 2 * F * itemsize + 3 * Hp * itemsize + 2 * 8 * itemsize
    budget_tb = max(128, (avail // per_elem) // 128 * 128)
    # Keep >= 2 balanced tiles whenever B allows it (v7x has 2 TensorCores;
    # no-op on v5e/v6e which have 1).
    two_tile_tb = _round_up(_cdiv(B, 2), 128)
    tb = min(budget_tb, max(128, max_tile_b), max(128, two_tile_tb))
    return max(128, tb)


def value_network_forward(x, params, *, max_tile_b=4096, vmem_budget_bytes=8 << 20):
    """Pallas equivalent of ValueNetwork.forward: returns shape (batch,)."""
    w1p, b1p, w2p, b2s = params
    B, F = x.shape
    Hp = w1p.shape[0]

    TB = _choose_tile_b(B, F, Hp, max_tile_b, vmem_budget_bytes)
    num_tiles = _cdiv(B, TB)          # ragged last tile: no padded copy of x
    B_pad = num_tiles * TB            # output allocated padded; pad lanes are garbage

    xT = x.astype(jnp.float32).T      # (F, B): batch lane-dense; layout plumbing only

    out = pl.pallas_call(
        value_net_kernel,
        out_shape=jax.ShapeDtypeStruct((1, B_pad), jnp.float32),
        grid=(num_tiles,),
        in_specs=[
            pl.BlockSpec((F, TB), lambda i: (0, i)),            # x^T: one tile / step
            pl.BlockSpec((Hp, F), lambda i: (0, 0)),            # W1: resident
            pl.BlockSpec((Hp, 1), lambda i: (0, 0)),            # b1: resident
            pl.BlockSpec((Hp, 1), lambda i: (0, 0)),            # w2: resident
            pl.BlockSpec(memory_space=pltpu.MemorySpace.SMEM),  # b2 scalar
        ],
        out_specs=pl.BlockSpec((1, TB), lambda i: (0, i)),
        compiler_params=pltpu.CompilerParams(
            dimension_semantics=("parallel",),   # megacore sharding on v7x
        ),
    )(xT, w1p, b1p, w2p, b2s)

    return out[0, :B]


def init_params(key, num_features, hidden_size):
    """PyTorch nn.Linear-style init, U(-1/sqrt(fan_in), 1/sqrt(fan_in)), PyTorch layout."""
    k1, k2, k3, k4 = jax.random.split(key, 4)
    lim1 = 1.0 / jnp.sqrt(jnp.float32(num_features))
    lim2 = 1.0 / jnp.sqrt(jnp.float32(hidden_size))
    w1 = jax.random.uniform(k1, (hidden_size, num_features), jnp.float32, -lim1, lim1)
    b1 = jax.random.uniform(k2, (hidden_size,), jnp.float32, -lim1, lim1)
    w2 = jax.random.uniform(k3, (1, hidden_size), jnp.float32, -lim2, lim2)
    b2 = jax.random.uniform(k4, (1,), jnp.float32, -lim2, lim2)
    return w1, b1, w2, b2


def _reference(x, w1, b1, w2, b2):
    h = jax.nn.sigmoid(x @ w1.T + b1)
    return (h @ w2.T + b2).squeeze(-1)


if __name__ == "__main__":
    # Run 1: single ragged tile (B=8 < TB=128), module-default hidden=100 (-> Hp=104).
    batch, num_features, hidden_size = 8, 16, 100
    key = jax.random.PRNGKey(0)
    kx, kp = jax.random.split(key)
    x = jax.random.normal(kx, (batch, num_features), jnp.float32)
    raw = init_params(kp, num_features, hidden_size)
    params = prepare_params(*raw)

    out = jax.block_until_ready(value_network_forward(x, params))
    ref = _reference(x, *raw)
    assert out.shape == (batch,)
    assert jnp.allclose(out, ref, atol=1e-3, rtol=1e-3), float(jnp.max(jnp.abs(out - ref)))

    # Run 2: multi-tile grid (B=640 -> TB=384, 2 tiles, second tile ragged).
    B2, F2, H2 = 640, 24, 100
    k1, k2 = jax.random.split(jax.random.PRNGKey(1))
    x2 = jax.random.normal(k1, (B2, F2), jnp.float32)
    raw2 = init_params(k2, F2, H2)
    params2 = prepare_params(*raw2)
    out2 = jax.block_until_ready(value_network_forward(x2, params2))
    ref2 = _reference(x2, *raw2)
    assert out2.shape == (B2,)
    assert jnp.allclose(out2, ref2, atol=1e-3, rtol=1e-3), float(jnp.max(jnp.abs(out2 - ref2)))

    print("KERNEL_OK")
</pallas_src>

<mosaic_0001>
module attributes {stable_mosaic.version = 11 : i64} {
  func.func @value_net_kernel(%arg0: i32, %arg1: memref<16x128xf32, #tpu.memory_space<vmem>>, %arg2: memref<104x16xf32, #tpu.memory_space<vmem>>, %arg3: memref<104x1xf32, #tpu.memory_space<vmem>>, %arg4: memref<104x1xf32, #tpu.memory_space<vmem>>, %arg5: memref<1xf32, #tpu.memory_space<smem>>, %arg6: memref<1x128xf32, #tpu.memory_space<vmem>>) attributes {dimension_semantics = [#tpu.dimension_semantics<parallel>], iteration_bounds = array<i64: 1>, scalar_prefetch = 0 : i64, scratch_operands = 0 : i64, tpu.core_type = #tpu.core_type<tc>, window_params = [{transform_indices = @transform_0, window_bounds = array<i64: 16, 128>}, {pipeline_mode = #tpu.pipeline_mode<synchronous>, transform_indices = @transform_1, window_bounds = array<i64: 104, 16>}, {pipeline_mode = #tpu.pipeline_mode<synchronous>, transform_indices = @transform_2, window_bounds = array<i64: 104, 1>}, {pipeline_mode = #tpu.pipeline_mode<synchronous>, transform_indices = @transform_3, window_bounds = array<i64: 104, 1>}, {transform_indices = @transform_4, window_bounds = array<i64: 1>}, {transform_indices = @transform_5, window_bounds = array<i64: 1, 128>}]} {
    %c0 = arith.constant 0 : index
    %c0_0 = arith.constant 0 : index
    %0 = vector.load %arg2[%c0, %c0_0] : memref<104x16xf32, #tpu.memory_space<vmem>>, vector<104x16xf32>
    %c0_1 = arith.constant 0 : index
    %c0_2 = arith.constant 0 : index
    %1 = vector.load %arg1[%c0_1, %c0_2] : memref<16x128xf32, #tpu.memory_space<vmem>>, vector<16x128xf32>
    %cst = arith.constant dense<0.000000e+00> : vector<104x128xf32>
    %2 = tpu.matmul %0, %1, %cst {dimension_numbers = #tpu.dot_dimension_numbers<[1], [0], [0], [1], [0, 0, 1, 1], [], []>} : vector<104x16xf32>, vector<16x128xf32>, vector<104x128xf32> -> vector<104x128xf32>
    %c0_3 = arith.constant 0 : index
    %c0_4 = arith.constant 0 : index
    %3 = vector.load %arg3[%c0_3, %c0_4] : memref<104x1xf32, #tpu.memory_space<vmem>>, vector<104x1xf32>
    %4 = vector.broadcast %3 : vector<104x1xf32> to vector<104x128xf32>
    %5 = arith.addf %2, %4 : vector<104x128xf32>
    %cst_5 = arith.constant 5.000000e-01 : f32
    %6 = vector.broadcast %cst_5 : f32 to vector<104x128xf32>
    %7 = arith.mulf %6, %5 : vector<104x128xf32>
    %8 = math.tanh %7 : vector<104x128xf32>
    %cst_6 = arith.constant 1.000000e+00 : f32
    %9 = vector.broadcast %cst_6 : f32 to vector<104x128xf32>
    %10 = arith.addf %9, %8 : vector<104x128xf32>
    %cst_7 = arith.constant 5.000000e-01 : f32
    %11 = vector.broadcast %cst_7 : f32 to vector<104x128xf32>
    %12 = arith.mulf %11, %10 : vector<104x128xf32>
    %c0_8 = arith.constant 0 : index
    %c0_9 = arith.constant 0 : index
    %13 = vector.load %arg4[%c0_8, %c0_9] : memref<104x1xf32, #tpu.memory_space<vmem>>, vector<104x1xf32>
    %14 = vector.broadcast %13 : vector<104x1xf32> to vector<104x128xf32>
    %15 = arith.mulf %12, %14 : vector<104x128xf32>
    %cst_10 = arith.constant dense<0.000000e+00> : vector<128xf32>
    %16 = vector.multi_reduction <add>, %15, %cst_10 [0] : vector<104x128xf32> to vector<128xf32>
    %17 = vector.shape_cast %16 : vector<128xf32> to vector<1x128xf32>
    %c0_11 = arith.constant 0 : index
    %18 = memref.load %arg5[%c0_11] : memref<1xf32, #tpu.memory_space<smem>>
    %19 = vector.broadcast %18 : f32 to vector<1x128xf32>
    %20 = arith.addf %17, %19 : vector<1x128xf32>
    %c0_12 = arith.constant 0 : index
    %c0_13 = arith.constant 0 : index
    %21 = vector.load %arg6[%c0_12, %c0_13] : memref<1x128xf32, #tpu.memory_space<vmem>>, vector<1x128xf32>
    tpu.vector_store %arg6[%c0_12, %c0_13], %20 {strides = array<i32>} : memref<1x128xf32, #tpu.memory_space<vmem>>, vector<1x128xf32>,
    return
  }
  func.func @transform_0(%arg0: i32) -> (i32, i32) {
    %c0_i32 = arith.constant 0 : i32
    %c0_i32_0 = arith.constant 0 : i32
    return %c0_i32, %arg0 : i32, i32
  }
  func.func @transform_1(%arg0: i32) -> (i32, i32) {
    %c0_i32 = arith.constant 0 : i32
    %c0_i32_0 = arith.constant 0 : i32
    %c0_i32_1 = arith.constant 0 : i32
    return %c0_i32, %c0_i32_0 : i32, i32
  }
  func.func @transform_2(%arg0: i32) -> (i32, i32) {
    %c0_i32 = arith.constant 0 : i32
    %c0_i32_0 = arith.constant 0 : i32
    %c0_i32_1 = arith.constant 0 : i32
    return %c0_i32, %c0_i32_0 : i32, i32
  }
  func.func @transform_3(%arg0: i32) -> (i32, i32) {
    %c0_i32 = arith.constant 0 : i32
    %c0_i32_0 = arith.constant 0 : i32
    %c0_i32_1 = arith.constant 0 : i32
    return %c0_i32, %c0_i32_0 : i32, i32
  }
  func.func @transform_4(%arg0: i32) -> i32 {
    %c0_i32 = arith.constant 0 : i32
    %c0_i32_0 = arith.constant 0 : i32
    return %c0_i32 : i32
  }
  func.func @transform_5(%arg0: i32) -> (i32, i32) {
    %c0_i32 = arith.constant 0 : i32
    %c0_i32_0 = arith.constant 0 : i32
    return %c0_i32, %arg0 : i32, i32
  }
}

</mosaic_0001>

<bundles_post_ra>
// kernel: tpu_custom_call.1
= control target key start
LH: loop header
LB: loop body
LE: loop exit
PB: predicated region body
PF: predicated region fallthrough
CT: control target
= control target key end

     0   :  { %v593_v1 = vmov 0.0   ;;  %vm115_vm0 = vcmask 130048   ;;  %vm594_vm1 = vmmov 0   ;;  %v595_v9 = vmov 0   ;;  %s799_s0 = inlined_call_operand.vmem [shape: f32[16,8], index: 0, kind: input, shape index: {}]   ;;  %s800_s1 = inlined_call_operand.vmem [shape: f32[104,16], index: 1, kind: input, shape index: {}]   ;;  %s801_s2 = inlined_call_operand.vmem [shape: f32[104,1], index: 2, kind: input, shape index: {}]   ;;  %s802_s3 = inlined_call_operand.vmem [shape: f32[104,1], index: 3, kind: input, shape index: {}]   ;;  %s803_s4 = inlined_call_operand.<no memory space> [shape: f32[1], index: 4, kind: input, shape index: {}]   ;;  %s804_s5 = inlined_call_operand.hbm [shape: f32[1,128], index: 5, kind: output, shape index: {}]  }
   0x1   :  { %v36_v0 = vld [vmem:[%s799_s0 + $0x8] sm:$0xff]  ;;  %492 = vmatprep.subr.mxu0 %v593_v1  ;;  %535 = vmatprep.subr.mxu1 %v593_v1  ;;  %v35_v2 = vld [vmem:[%s799_s0] sm:$0xff]  ;;  %v29_v4 = vld [vmem:[%s800_s1 + $0x38] sm:$0xff] }
   0x2   :  { %493 = vmatpush3.msra.mxu0 %v36_v0  ;;  %537 = vmatpush3.msra.mxu1 %v36_v0  ;;  %v22_v3 = vld [vmem:[%s800_s1] sm:$0xff]  ;;  %v39_v6 = vld [vmem:[%s801_s2 + $0x10] sm:$0xff]  ;;  %v23_v7 = vld [vmem:[%s800_s1 + $0x8] sm:$0xff] }
   0x3   :  { %494 = vmatprep.subr.mxu0 %v593_v1  ;;  %536 = vmatprep.subr.mxu1 %v593_v1  ;;  %v37_v5 = vld [vmem:[%s801_s2] sm:$0xff]  ;;  %v38_v10 = vld [vmem:[%s801_s2 + $0x8] sm:$0xff]  ;;  %v40_v11 = vld [vmem:[%s801_s2 + $0x18] sm:$0xff] }
   0x4   :  { %495 = vmatpush3.msra.mxu0 %v35_v2  ;;  %538 = vmatpush3.msra.mxu1 %v35_v2  ;;  %v30_v8 = vld [vmem:[%s800_s1 + $0x40] sm:$0xff]  ;;  %v24_v12 = vld [vmem:[%s800_s1 + $0x10] sm:$0xff]  ;;  %v31_v13 = vld [vmem:[%s800_s1 + $0x48] sm:$0xff] }
   0x5   :  { %496 = vmatprep.mubr.msk.f32.mxu0 %vm594_vm1, %v593_v1  ;;  %517 = vmatprep.mubr.msk.f32.mxu1 %vm594_vm1, %v593_v1 }
   0x6   :  { %497 = vmatmul.mubr.msk.f32.vlgmr.msra.gmra.mxu0 %vm115_vm0, %v22_v3  ;;  %518 = vmatmul.mubr.msk.f32.vlgmr.msra.gmra.mxu1 %vm115_vm0, %v29_v4 }
   0x7   :  { %499 = vmatprep.mubr.msk.f32.mxu0 %vm594_vm1, %v593_v1  ;;  %520 = vmatprep.mubr.msk.f32.mxu1 %vm594_vm1, %v593_v1 }
   0x8   :  { %543 = vset.pattern.permute.xlu0 %v595_v9  ;;  %544 = vset.pattern.permute.xlu1 %v595_v9 }
   0x9   :  { %52 = vperm.xlu0 %543, %v37_v5   ;;  %62 = vperm.xlu1 %544, %v39_v6  }
   0xa   :  { %500 = vmatmul.mubr.msk.f32.gmra.mxu0 %vm115_vm0, %v23_v7  ;;  %521 = vmatmul.mubr.msk.f32.gmra.mxu1 %vm115_vm0, %v30_v8 }
   0xb   :  { %502 = vmatprep.mubr.msk.f32.mxu0 %vm594_vm1, %v593_v1  ;;  %523 = vmatprep.mubr.msk.f32.mxu1 %vm594_vm1, %v593_v1 }
   0xd   :  { %57 = vperm.xlu0 %543, %v38_v10   ;;  %67 = vperm.xlu1 %544, %v40_v11  }
   0xe   :  { %11 = vsyncpa [#allocation4], 0  ;;  %503 = vmatmul.mubr.msk.f32.gmra.mxu0 %vm115_vm0, %v24_v12  ;;  %524 = vmatmul.mubr.msk.f32.gmra.mxu1 %vm115_vm0, %v31_v13  ;;  %v41_v14 = vld [vmem:[%s801_s2 + $0x20] sm:$0xff]  ;;  %v42_v15 = vld [vmem:[%s801_s2 + $0x28] sm:$0xff]  ;;  %s596_s21 = smov [#allocation3]  }
   0xf   :  { %505 = vmatprep.mubr.msk.f32.mxu0 %vm594_vm1, %v593_v1  ;;  %526 = vmatprep.mubr.msk.f32.mxu1 %vm594_vm1, %v593_v1  ;;  %v25_v16 = vld [vmem:[%s800_s1 + $0x18] sm:$0xff]  ;;  %v32_v17 = vld [vmem:[%s800_s1 + $0x50] sm:$0xff]  ;;  %v26_v20 = vld [vmem:[%s800_s1 + $0x20] sm:$0xff]  ;;  %s456_s22 = sshll.u32 %s596_s21, 4  ;;  %s457_s22 = int_to_ptr.vmem [resolvable:$true] %s456_s22 }
  0x10   :  { %v43_v18 = vld [vmem:[%s801_s2 + $0x30] sm:$0xff]  ;;  %v44_v19 = vld [vmem:[%s801_s2 + $0x38] sm:$0xff]  ;;  %v45_v22 = vld [vmem:[%s801_s2 + $0x40] sm:$0xff]  ;;  %s571_s23 = scalar_lea.vmem %s457_s22, 16  ;;  %s575_s24 = scalar_lea.vmem %s457_s22, 32 }
  0x11   :  { %72 = vperm.xlu0 %543, %v41_v14   ;;  %77 = vperm.xlu1 %544, %v42_v15   ;;  %v33_v21 = vld [vmem:[%s800_s1 + $0x58] sm:$0xff]  ;;  %v46_v23 = vld [vmem:[%s801_s2 + $0x48] sm:$0xff]  ;;  %v34_v25 = vld [vmem:[%s800_s1 + $0x60] sm:$0xff]  ;;  %p572_p0 = scmp.ne.s32.totalorder %s457_s22, %s571_s23  ;;  %p576_p1 = scmp.lt.s32.totalorder %s457_s22, %s457_s22 }
  0x12   :  { %506 = vmatmul.mubr.msk.f32.gmra.mxu0 %vm115_vm0, %v25_v16  ;;  %527 = vmatmul.mubr.msk.f32.gmra.mxu1 %vm115_vm0, %v32_v17  ;;  %v27_v24 = vld [vmem:[%s800_s1 + $0x28] sm:$0xff]  ;;  %v47_v26 = vld [vmem:[%s801_s2 + $0x50] sm:$0xff]  ;;  %v48_v27 = vld [vmem:[%s801_s2 + $0x58] sm:$0xff]  ;;  %p577_p2 = scmp.lt.s32.totalorder %s575_s24, %s571_s23 }
  0x13   :  { %508 = vmatprep.mubr.msk.f32.mxu0 %vm594_vm1, %v593_v1  ;;  %529 = vmatprep.mubr.msk.f32.mxu1 %vm594_vm1, %v593_v1  ;;  %v28_v28 = vld [vmem:[%s800_s1 + $0x30] sm:$0xff]  ;;  %v49_v29 = vld [vmem:[%s801_s2 + $0x60] sm:$0xff]  ;;  %v338_v31 = vld [vmem:[%s802_s3 + $0x8] sm:$0xff] }
  0x14   :  { %v337_v30 = vld [vmem:[%s802_s3] sm:$0xff]  ;;  %v339_v32 = vld [vmem:[%s802_s3 + $0x10] sm:$0xff]  ;;  %v340_v33 = vld [vmem:[%s802_s3 + $0x18] sm:$0xff]  ;;  %p578_p3 = por %p577_p2, %p576_p1 }
  0x15   :  { %82 = vperm.xlu0 %543, %v43_v18   ;;  %87 = vperm.xlu1 %544, %v44_v19   ;;  %v341_v34 = vld [vmem:[%s802_s3 + $0x20] sm:$0xff]  ;;  %v342_v35 = vld [vmem:[%s802_s3 + $0x28] sm:$0xff]  ;;  %v343_v36 = vld [vmem:[%s802_s3 + $0x30] sm:$0xff] }
  0x16   :  { %509 = vmatmul.mubr.msk.f32.gmra.mxu0 %vm115_vm0, %v26_v20  ;;  %530 = vmatmul.mubr.msk.f32.gmra.mxu1 %vm115_vm0, %v33_v21  ;;  %v344_v37 = vld [vmem:[%s802_s3 + $0x38] sm:$0xff]  ;;  %v345_v38 = vld [vmem:[%s802_s3 + $0x40] sm:$0xff]  ;;  %v346_v39 = vld [vmem:[%s802_s3 + $0x48] sm:$0xff]  ;;  %p579_p4 = pnand %p578_p3, %p572_p0 }
  0x17   :  { %511 = vmatprep.mubr.msk.f32.mxu0 %vm594_vm1, %v593_v1  ;;  %532 = vmatprep.mubr.msk.f32.mxu1 %vm594_vm1, %v593_v1  ;;  %v347_v40 = vld [vmem:[%s802_s3 + $0x50] sm:$0xff]  ;;  %v348_v41 = vld [vmem:[%s802_s3 + $0x58] sm:$0xff]  ;;  %v349_v42 = vld [vmem:[%s802_s3 + $0x60] sm:$0xff] }
  0x19   :  { %92 = vperm.xlu0 %543, %v45_v22   ;;  %97 = vperm.xlu1 %544, %v46_v23  }
  0x1a   :  { %512 = vmatmul.mubr.msk.f32.gmra.mxu0 %vm115_vm0, %v27_v24  ;;  %533 = vmatmul.mubr.msk.f32.gmra.mxu1 %vm115_vm0, %v34_v25 }
  0x1b   :  { %514 = vmatprep.mubr.msk.f32.mxu0 %vm594_vm1, %v593_v1 }
  0x1d   :  { %102 = vperm.xlu0 %543, %v47_v26   ;;  %107 = vperm.xlu1 %544, %v48_v27  }
  0x1e   :  { %515 = vmatmul.mubr.msk.f32.gmra.mxu0 %vm115_vm0, %v28_v28 }
  0x21   :  { %112 = vperm.xlu0 %543, %v49_v29   ;;  %352 = vperm.xlu1 %544, %v337_v30  }
  0x25   :  { %357 = vperm.xlu0 %543, %v338_v31   ;;  %362 = vperm.xlu1 %544, %v339_v32  }
  0x29   :  { %367 = vperm.xlu0 %543, %v340_v33   ;;  %372 = vperm.xlu1 %544, %v341_v34  }
  0x2d   :  { %377 = vperm.xlu0 %543, %v342_v35   ;;  %382 = vperm.xlu1 %544, %v343_v36  }
  0x31   :  { %387 = vperm.xlu0 %543, %v344_v37   ;;  %392 = vperm.xlu1 %544, %v345_v38  }
  0x35   :  { %397 = vperm.xlu0 %543, %v346_v39   ;;  %402 = vperm.xlu1 %544, %v347_v40  }
  0x39   :  { %407 = vperm.xlu0 %543, %v348_v41   ;;  %412 = vperm.xlu1 %544, %v349_v42  }
  0x84   :  { %v53_v43 = vpop.permute.xlu0 %52  ;;  %v63_v44 = vpop.permute.xlu1 %62 }
  0x88   :  { %v58_v45 = vpop.permute.xlu0 %57  ;;  %v68_v46 = vpop.permute.xlu1 %67 }
  0x8c   :  { %v73_v47 = vpop.permute.xlu0 %72  ;;  %v78_v48 = vpop.permute.xlu1 %77 }
  0x90   :  { %v83_v51 = vpop.permute.xlu0 %82  ;;  %v88_v54 = vpop.permute.xlu1 %87 }
  0x94   :  { %v93_v61 = vpop.permute.xlu0 %92  ;;  %v98_v2 = vpop.permute.xlu1 %97 }
  0x98   :  { %v103_v9 = vpop.permute.xlu0 %102  ;;  %v108_v13 = vpop.permute.xlu1 %107 }
  0x9c   :  { %v113_v22 = vpop.permute.xlu0 %112  ;;  %v353_v28 = vpop.permute.xlu1 %352 }
  0xa0   :  { %v358_v42 = vpop.permute.xlu0 %357 }
  0xc6   :  { %v221_v49 = vpop.f32.mrf.mxu0  ;;  %v256_v50 = vpop.f32.mrf.mxu1 }
  0xc7   :  { %v222_v55 = vadd.f32 %v221_v49, %v53_v43  ;;  %v257_v15 = vadd.f32 %v256_v50, %v88_v54 }
  0xc8   :  { %v498_v52 = vpop.f32.mrf.mxu0  ;;  %v519_v53 = vpop.f32.mrf.mxu1 }
  0xc9   :  { %v285_v63 = vmul.f32 0.5, %v222_v55  ;;  %v292_v24 = vmul.f32 0.5, %v257_v15 }
  0xca   :  { %v226_v56 = vpop.f32.mrf.mxu0  ;;  %v261_v57 = vpop.f32.mrf.mxu1 }
  0xcb   :  { %v227_v58 = vadd.f32 %v226_v56, %v58_v45  ;;  %v262_v19 = vadd.f32 %v261_v57, %v93_v61 }
  0xcc   :  { %v501_v59 = vpop.f32.mrf.mxu0  ;;  %v522_v60 = vpop.f32.mrf.mxu1 }
  0xcd   :  { %v286_v62 = vmul.f32 0.5, %v227_v58  ;;  %v293_v30 = vmul.f32 0.5, %v262_v19 }
  0xce   :  { %v231_v0 = vpop.f32.mrf.mxu0  ;;  %v266_v1 = vpop.f32.mrf.mxu1 }
  0xcf   :  { %v232_v3 = vadd.f32 %v231_v0, %v63_v44  ;;  %545 = vtanh.f32 %v286_v62  ;;  %v267_v25 = vadd.f32 %v266_v1, %v98_v2 }
  0xd0   :  { %v504_v4 = vpop.f32.mrf.mxu0  ;;  %v525_v5 = vpop.f32.mrf.mxu1  ;;  %547 = vtanh.f32 %v285_v63 }
  0xd1   :  { %v287_v6 = vmul.f32 0.5, %v232_v3  ;;  %v294_v36 = vmul.f32 0.5, %v267_v25 }
  0xd2   :  { %v236_v7 = vpop.f32.mrf.mxu0  ;;  %v271_v8 = vpop.f32.mrf.mxu1 }
  0xd3   :  { %549 = vtanh.f32 %v287_v6  ;;  %v237_v10 = vadd.f32 %v236_v7, %v68_v46  ;;  %v272_v33 = vadd.f32 %v271_v8, %v103_v9 }
  0xd4   :  { %v507_v11 = vpop.f32.mrf.mxu0  ;;  %v528_v12 = vpop.f32.mrf.mxu1 }
  0xd5   :  { %v288_v14 = vmul.f32 0.5, %v237_v10  ;;  %v295_v45 = vmul.f32 0.5, %v272_v33 }
  0xd6   :  { %v241_v16 = vpop.f32.mrf.mxu0  ;;  %v276_v17 = vpop.f32.mrf.mxu1 }
  0xd7   :  { %551 = vtanh.f32 %v288_v14  ;;  %v242_v18 = vadd.f32 %v241_v16, %v73_v47  ;;  %v277_v39 = vadd.f32 %v276_v17, %v108_v13 }
  0xd8   :  { %v510_v20 = vpop.f32.mrf.mxu0  ;;  %v531_v21 = vpop.f32.mrf.mxu1 }
  0xd9   :  { %v289_v23 = vmul.f32 0.5, %v242_v18  ;;  %v296_v52 = vmul.f32 0.5, %v277_v39 }
  0xda   :  { %v246_v26 = vpop.f32.mrf.mxu0  ;;  %v281_v27 = vpop.f32.mrf.mxu1 }
  0xdb   :  { %553 = vtanh.f32 %v289_v23  ;;  %v247_v29 = vadd.f32 %v246_v26, %v78_v48  ;;  %v282_v46 = vadd.f32 %v281_v27, %v113_v22  ;;  %v363_v48 = vpop.permute.xlu1 %362 }
  0xdc   :  { %v513_v31 = vpop.f32.mrf.mxu0  ;;  %v534_v32 = vpop.f32.mrf.mxu1  ;;  %555 = vtanh.f32 %v292_v24 }
  0xdd   :  { %v290_v34 = vmul.f32 0.5, %v247_v29  ;;  %v546_v35 = vpop.eup %545  ;;  %v297_v56 = vmul.f32 0.5, %v282_v46 }
  0xde   :  { %v251_v37 = vpop.f32.mrf.mxu0  ;;  %v548_v38 = vpop.eup %547  ;;  %v312_v44 = vadd.f32 1.0, %v546_v35 }
  0xdf   :  { %557 = vtanh.f32 %v290_v34  ;;  %v252_v40 = vadd.f32 %v251_v37, %v83_v51  ;;  %v311_v49 = vadd.f32 1.0, %v548_v38  ;;  %v368_v51 = vpop.permute.xlu0 %367  ;;  %v373_v60 = vpop.permute.xlu1 %372 }
  0xe0   :  { %v550_v41 = vpop.eup %549  ;;  %559 = vtanh.f32 %v293_v30  ;;  %v516_v43 = vpop.f32.mrf.mxu0  ;;  %v325_v54 = vmul.f32 0.5, %v312_v44 }
  0xe1   :  { %v291_v47 = vmul.f32 0.5, %v252_v40  ;;  %561 = vtanh.f32 %v294_v36  ;;  %v313_v50 = vadd.f32 1.0, %v550_v41  ;;  %v324_v57 = vmul.f32 0.5, %v311_v49 }
  0xe2   :  { %v416_v61 = vmul.f32 %v358_v42, %v325_v54 }
  0xe3   :  { %563 = vtanh.f32 %v291_v47  ;;  %v326_v58 = vmul.f32 0.5, %v313_v50  ;;  %v415_v1 = vmul.f32 %v353_v28, %v324_v57  ;;  %v378_v5 = vpop.permute.xlu0 %377  ;;  %v383_v10 = vpop.permute.xlu1 %382 }
  0xe4   :  { %v552_v53 = vpop.eup %551  ;;  %565 = vtanh.f32 %v295_v45 }
  0xe5   :  { %v314_v55 = vadd.f32 1.0, %v552_v53  ;;  %567 = vtanh.f32 %v296_v52  ;;  %v417_v2 = vmul.f32 %v363_v48, %v326_v58  ;;  %v428_v7 = vadd.f32 %v416_v61, %v415_v1 }
  0xe6   :  { %569 = vtanh.f32 %v297_v56 }
  0xe7   :  { %v327_v62 = vmul.f32 0.5, %v314_v55  ;;  %v429_v13 = vadd.f32 %v428_v7, %v417_v2  ;;  %v388_v22 = vpop.permute.xlu0 %387  ;;  %v393_v28 = vpop.permute.xlu1 %392 }
  0xe8   :  { %v554_v59 = vpop.eup %553 }
  0xe9   :  { %v315_v63 = vadd.f32 1.0, %v554_v59  ;;  %v556_v0 = vpop.eup %555  ;;  %v418_v8 = vmul.f32 %v368_v51, %v327_v62  ;;  %v447_v62 = vstv %s803_s4 }
  0xea   :  { %v318_v12 = vadd.f32 1.0, %v556_v0 }
  0xeb   :  { %v328_v3 = vmul.f32 0.5, %v315_v63  ;;  %v430_v18 = vadd.f32 %v429_v13, %v418_v8  ;;  %v398_v38 = vpop.permute.xlu0 %397  ;;  %v403_v43 = vpop.permute.xlu1 %402 }
  0xec   :  { %v558_v4 = vpop.eup %557  ;;  %v331_v23 = vmul.f32 0.5, %v318_v12 }
  0xed   :  { %v560_v6 = vpop.eup %559  ;;  %v316_v9 = vadd.f32 1.0, %v558_v4  ;;  %v419_v14 = vmul.f32 %v373_v60, %v328_v3 }
  0xee   :  { %v562_v11 = vpop.eup %561  ;;  %v319_v17 = vadd.f32 1.0, %v560_v6  ;;  %v422_v34 = vmul.f32 %v388_v22, %v331_v23 }
  0xef   :  { %v329_v15 = vmul.f32 0.5, %v316_v9  ;;  %v320_v24 = vadd.f32 1.0, %v562_v11  ;;  %v431_v25 = vadd.f32 %v430_v18, %v419_v14  ;;  %v408_v50 = vpop.permute.xlu0 %407  ;;  %v413_v54 = vpop.permute.xlu1 %412 }
  0xf0   :  { %v564_v16 = vpop.eup %563  ;;  %v332_v29 = vmul.f32 0.5, %v319_v17 }
  0xf1   :  { %v420_v19 = vmul.f32 %v378_v5, %v329_v15  ;;  %v317_v20 = vadd.f32 1.0, %v564_v16  ;;  %v566_v21 = vpop.eup %565  ;;  %v333_v35 = vmul.f32 0.5, %v320_v24 }
  0xf2   :  { %v568_v27 = vpop.eup %567  ;;  %v321_v30 = vadd.f32 1.0, %v566_v21  ;;  %v423_v39 = vmul.f32 %v393_v28, %v332_v29 }
  0xf3   :  { %v330_v26 = vmul.f32 0.5, %v317_v20  ;;  %v432_v31 = vadd.f32 %v431_v25, %v420_v19  ;;  %v570_v33 = vpop.eup %569  ;;  %v322_v36 = vadd.f32 1.0, %v568_v27  ;;  %v424_v44 = vmul.f32 %v398_v38, %v333_v35 }
  0xf4   :  { %v334_v40 = vmul.f32 0.5, %v321_v30  ;;  %v323_v41 = vadd.f32 1.0, %v570_v33 }
  0xf5   :  { %v421_v32 = vmul.f32 %v383_v10, %v330_v26  ;;  %v335_v45 = vmul.f32 0.5, %v322_v36 }
  0xf6   :  { %v425_v47 = vmul.f32 %v403_v43, %v334_v40  ;;  %v336_v48 = vmul.f32 0.5, %v323_v41 }
  0xf7   :  { %v433_v37 = vadd.f32 %v432_v31, %v421_v32  ;;  %v426_v52 = vmul.f32 %v408_v50, %v335_v45 }
  0xf8   :  { %v427_v55 = vmul.f32 %v413_v54, %v336_v48 }
  0xf9   :  { %v434_v42 = vadd.f32 %v433_v37, %v422_v34 }
  0xfb   :  { %v435_v46 = vadd.f32 %v434_v42, %v423_v39 }
  0xfd   :  { %v436_v49 = vadd.f32 %v435_v46, %v424_v44 }
  0xff   :  { %v437_v53 = vadd.f32 %v436_v49, %v425_v47 }
 0x101   :  { %v438_v56 = vadd.f32 %v437_v53, %v426_v52 }
 0x103   :  { %v439_v51 = vadd.f32 %v438_v56, %v427_v55 }
 0x105   :  { %v440_v57 = vrot.slane %v439_v51, 4 }
 0x107   :  { %v441_v58 = vadd.f32 %v440_v57, %v439_v51 }
 0x109   :  { %v442_v59 = vrot.slane %v441_v58, 2 }
 0x10b   :  { %v443_v60 = vadd.f32 %v442_v59, %v441_v58 }
 0x10d   :  { %v444_v61 = vrot.slane %v443_v60, 1 }
 0x10f   :  { %v445_v63 = vadd.f32 %v444_v61, %v443_v60 }
 0x111   :  { %v448_v0 = vadd.f32 %v447_v62, %v445_v63 }
 0x113   :  { %449 = vst [vmem:[#allocation3] sm:$0x1] %v448_v0 }
 0x114   :  { %582 = shalt.err (!%p579_p4)
}
 0x115   :  { %459 = dma.vmem_to_hbm [thread:$0]  %s457_s22, 16, %s804_s5, [#allocation4]  }
 0x116   :  { %591 = dma.done.wait [#allocation4], 16  }
 0x117   :  { %592 = vsyncadd [#allocation4], 4294967280 }
 0x118   :  { %463 = vsyncpa [#allocation4], 1 }

</bundles_post_ra>
